<compile_context>
chip_gen: v7x
topology: tpu7x:2x2x1
jax: 0.10.0
libtpu: 0.0.40
codegen_flags: <defaults>
</compile_context>

<pallas_src>
import functools

import jax
import jax.numpy as jnp
from jax.experimental import pallas as pl
from jax.experimental.pallas import tpu as pltpu

F_IN = 57      # num_attributes
HID = 128      # num_neurons
N_OUT = 1      # num_classes


def _round_up(n, m):
    return ((n + m - 1) // m) * m


def _choose_tb(batch, max_tb):
    """Batch tile size: multiple of 128, capped at max_tb, and >= 2 grid steps
    whenever the batch is big enough (so v7x megacore can shard the batch axis)."""
    if batch <= 128:
        return 128
    half = _round_up(pl.cdiv(batch, 2), 128)
    return int(min(int(max_tb), half))


def mlp_kernel(x_ref, w1t_ref, b1_ref, w2t_ref, b2_ref, w3_ref, b3_ref, o_ref):
    # x_ref: (TB, F_IN) f32, batch-major -- one contiguous HBM slab per tile.
    x = x_ref[...]

    # Layer 1: h1^T = W1^T . x^T  via dot_general contracting the feature axis
    # of both operands (transposed-RHS matmul; Mosaic handles the transpose in
    # VMEM where the XLU slot is otherwise idle).  -> (HID, TB), f32 accumulate.
    h1t = jax.lax.dot_general(
        w1t_ref[...], x,
        dimension_numbers=(((1,), (1,)), ((), ())),
        preferred_element_type=jnp.float32)
    h1t = jnp.maximum(h1t + b1_ref[...], 0.0)           # bias (HID,1) bcasts over lanes

    # Layer 2: (HID, HID) @ (HID, TB) -> (HID, TB)
    h2t = jnp.dot(w2t_ref[...], h1t, preferred_element_type=jnp.float32)
    h2t = jnp.maximum(h2t + b2_ref[...], 0.0)

    # Layer 3 (N_OUT=1): sublane reduction on VPU/XLU instead of an M=1 MXU matmul.
    logits = jnp.sum(h2t * w3_ref[...], axis=0, keepdims=True) + b3_ref[...]   # (1, TB)

    o_ref[...] = jax.nn.sigmoid(logits).astype(o_ref.dtype)   # lane-dense (1, TB) store


@functools.partial(jax.jit, static_argnames=("max_tb",))
def baseline_cnn_forward(x, params, max_tb=2048):
    """x: (B, 57) float32. params: W1 (57,128), b1 (128,), W2 (128,128), b2 (128,),
    W3 (128,1), b3 (1,). Returns (B, 1) float32 sigmoid outputs."""
    B = x.shape[0]
    TB = _choose_tb(B, max_tb)
    num_tiles = pl.cdiv(B, TB)
    B_pad = num_tiles * TB          # only the *output* buffer is padded (cheap)

    # Tiny, one-time weight reshapes (resident in VMEM across all grid steps).
    w1t = params["W1"].T.astype(jnp.float32)               # (HID, F_IN)
    w2t = params["W2"].T.astype(jnp.float32)               # (HID, HID)
    b1c = params["b1"].reshape(HID, 1).astype(jnp.float32)
    b2c = params["b2"].reshape(HID, 1).astype(jnp.float32)
    w3c = params["W3"].reshape(HID, 1).astype(jnp.float32)
    b3c = params["b3"].reshape(1, 1).astype(jnp.float32)

    cost = pl.CostEstimate(
        flops=2 * B_pad * (F_IN * HID + HID * HID + HID),
        transcendentals=2 * B_pad,  # sigmoid ~ exp + reciprocal
        bytes_accessed=(B * F_IN + B_pad) * 4
                       + (w1t.size + w2t.size + b1c.size + b2c.size
                          + w3c.size + b3c.size) * 4,
    )

    out = pl.pallas_call(
        mlp_kernel,
        out_shape=jax.ShapeDtypeStruct((1, B_pad), jnp.float32),
        grid=(num_tiles,),
        in_specs=[
            pl.BlockSpec((TB, F_IN), lambda i: (i, 0)),    # x tile (pipelined, contiguous)
            pl.BlockSpec((HID, F_IN), lambda i: (0, 0)),   # W1^T (resident)
            pl.BlockSpec((HID, 1), lambda i: (0, 0)),      # b1
            pl.BlockSpec((HID, HID), lambda i: (0, 0)),    # W2^T (resident)
            pl.BlockSpec((HID, 1), lambda i: (0, 0)),      # b2
            pl.BlockSpec((HID, 1), lambda i: (0, 0)),      # w3 column
            pl.BlockSpec((1, 1), lambda i: (0, 0)),        # b3
        ],
        out_specs=pl.BlockSpec((1, TB), lambda i: (0, i)), # lane-dense output slab
        compiler_params=pltpu.CompilerParams(
            dimension_semantics=("parallel",)),            # megacore batch sharding
        cost_estimate=cost,
    )(x.astype(jnp.float32), w1t, b1c, w2t, b2c, w3c, b3c)

    return out[0, :B].reshape(B, 1)


def init_params(key):
    k1, k2, k3, k4, k5, k6 = jax.random.split(key, 6)

    def linear_init(kw, kb, fan_in, fan_out):
        # Mimic torch.nn.Linear default init: U(-1/sqrt(fan_in), 1/sqrt(fan_in))
        bound = 1.0 / jnp.sqrt(fan_in)
        W = jax.random.uniform(kw, (fan_in, fan_out), jnp.float32, -bound, bound)
        b = jax.random.uniform(kb, (fan_out,), jnp.float32, -bound, bound)
        return W, b

    W1, b1 = linear_init(k1, k2, F_IN, HID)
    W2, b2 = linear_init(k3, k4, HID, HID)
    W3, b3 = linear_init(k5, k6, HID, N_OUT)
    return {"W1": W1, "b1": b1, "W2": W2, "b2": b2, "W3": W3, "b3": b3}


if __name__ == "__main__":
    key = jax.random.PRNGKey(0)
    kp, kx = jax.random.split(key)

    params = init_params(kp)
    B = 8
    x = jax.random.normal(kx, (B, F_IN), dtype=jnp.float32)

    out = baseline_cnn_forward(x, params)
    out = jax.block_until_ready(out)
    assert out.shape == (B, 1)

    # Pure-JAX f32 reference (same semantics as the PyTorch module).
    h1 = jnp.maximum(x @ params["W1"] + params["b1"], 0.0)
    h2 = jnp.maximum(h1 @ params["W2"] + params["b2"], 0.0)
    ref = jax.nn.sigmoid(h2 @ params["W3"] + params["b3"]).reshape(B, 1)

    assert jnp.allclose(out, ref, atol=2e-3, rtol=2e-3), "mismatch vs reference"

    print("KERNEL_OK")
</pallas_src>

<mosaic_0001>
module attributes {stable_mosaic.version = 11 : i64} {
  func.func @mlp_kernel(%arg0: i32, %arg1: memref<128x57xf32, #tpu.memory_space<vmem>>, %arg2: memref<128x57xf32, #tpu.memory_space<vmem>>, %arg3: memref<128x1xf32, #tpu.memory_space<vmem>>, %arg4: memref<128x128xf32, #tpu.memory_space<vmem>>, %arg5: memref<128x1xf32, #tpu.memory_space<vmem>>, %arg6: memref<128x1xf32, #tpu.memory_space<vmem>>, %arg7: memref<1x1xf32, #tpu.memory_space<vmem>>, %arg8: memref<1x128xf32, #tpu.memory_space<vmem>>) attributes {dimension_semantics = [#tpu.dimension_semantics<parallel>], iteration_bounds = array<i64: 1>, scalar_prefetch = 0 : i64, scratch_operands = 0 : i64, tpu.core_type = #tpu.core_type<tc>, window_params = [{transform_indices = @transform_0, window_bounds = array<i64: 128, 57>}, {pipeline_mode = #tpu.pipeline_mode<synchronous>, transform_indices = @transform_1, window_bounds = array<i64: 128, 57>}, {pipeline_mode = #tpu.pipeline_mode<synchronous>, transform_indices = @transform_2, window_bounds = array<i64: 128, 1>}, {pipeline_mode = #tpu.pipeline_mode<synchronous>, transform_indices = @transform_3, window_bounds = array<i64: 128, 128>}, {pipeline_mode = #tpu.pipeline_mode<synchronous>, transform_indices = @transform_4, window_bounds = array<i64: 128, 1>}, {pipeline_mode = #tpu.pipeline_mode<synchronous>, transform_indices = @transform_5, window_bounds = array<i64: 128, 1>}, {pipeline_mode = #tpu.pipeline_mode<synchronous>, transform_indices = @transform_6, window_bounds = array<i64: 1, 1>}, {transform_indices = @transform_7, window_bounds = array<i64: 1, 128>}]} {
    %c0 = arith.constant 0 : index
    %c0_0 = arith.constant 0 : index
    %0 = vector.load %arg1[%c0, %c0_0] : memref<128x57xf32, #tpu.memory_space<vmem>>, vector<128x57xf32>
    %c0_1 = arith.constant 0 : index
    %c0_2 = arith.constant 0 : index
    %1 = vector.load %arg2[%c0_1, %c0_2] : memref<128x57xf32, #tpu.memory_space<vmem>>, vector<128x57xf32>
    %cst = arith.constant dense<0.000000e+00> : vector<128x128xf32>
    %2 = tpu.matmul %1, %0, %cst {dimension_numbers = #tpu.dot_dimension_numbers<[1], [1], [0], [0], [0, 0, 1, 0], [], []>} : vector<128x57xf32>, vector<128x57xf32>, vector<128x128xf32> -> vector<128x128xf32>
    %c0_3 = arith.constant 0 : index
    %c0_4 = arith.constant 0 : index
    %3 = vector.load %arg3[%c0_3, %c0_4] : memref<128x1xf32, #tpu.memory_space<vmem>>, vector<128x1xf32>
    %4 = vector.broadcast %3 : vector<128x1xf32> to vector<128x128xf32>
    %5 = arith.addf %2, %4 : vector<128x128xf32>
    %cst_5 = arith.constant 0.000000e+00 : f32
    %6 = vector.broadcast %cst_5 : f32 to vector<128x128xf32>
    %7 = arith.maximumf %5, %6 : vector<128x128xf32>
    %c0_6 = arith.constant 0 : index
    %c0_7 = arith.constant 0 : index
    %8 = vector.load %arg4[%c0_6, %c0_7] : memref<128x128xf32, #tpu.memory_space<vmem>>, vector<128x128xf32>
    %cst_8 = arith.constant dense<0.000000e+00> : vector<128x128xf32>
    %9 = tpu.matmul %8, %7, %cst_8 {dimension_numbers = #tpu.dot_dimension_numbers<[1], [0], [0], [1], [0, 0, 1, 1], [], []>} : vector<128x128xf32>, vector<128x128xf32>, vector<128x128xf32> -> vector<128x128xf32>
    %c0_9 = arith.constant 0 : index
    %c0_10 = arith.constant 0 : index
    %10 = vector.load %arg5[%c0_9, %c0_10] : memref<128x1xf32, #tpu.memory_space<vmem>>, vector<128x1xf32>
    %11 = vector.broadcast %10 : vector<128x1xf32> to vector<128x128xf32>
    %12 = arith.addf %9, %11 : vector<128x128xf32>
    %cst_11 = arith.constant 0.000000e+00 : f32
    %13 = vector.broadcast %cst_11 : f32 to vector<128x128xf32>
    %14 = arith.maximumf %12, %13 : vector<128x128xf32>
    %c0_12 = arith.constant 0 : index
    %c0_13 = arith.constant 0 : index
    %15 = vector.load %arg6[%c0_12, %c0_13] : memref<128x1xf32, #tpu.memory_space<vmem>>, vector<128x1xf32>
    %16 = vector.broadcast %15 : vector<128x1xf32> to vector<128x128xf32>
    %17 = arith.mulf %14, %16 : vector<128x128xf32>
    %cst_14 = arith.constant dense<0.000000e+00> : vector<128xf32>
    %18 = vector.multi_reduction <add>, %17, %cst_14 [0] : vector<128x128xf32> to vector<128xf32>
    %19 = vector.shape_cast %18 : vector<128xf32> to vector<1x128xf32>
    %c0_15 = arith.constant 0 : index
    %c0_16 = arith.constant 0 : index
    %20 = vector.load %arg7[%c0_15, %c0_16] : memref<1x1xf32, #tpu.memory_space<vmem>>, vector<1x1xf32>
    %21 = vector.broadcast %20 : vector<1x1xf32> to vector<1x128xf32>
    %22 = arith.addf %19, %21 : vector<1x128xf32>
    %23 = arith.negf %22 : vector<1x128xf32>
    %24 = math.exp %23 : vector<1x128xf32>
    %cst_17 = arith.constant 1.000000e+00 : f32
    %25 = vector.broadcast %cst_17 : f32 to vector<1x128xf32>
    %26 = arith.addf %25, %24 : vector<1x128xf32>
    %27 = arith.divf %25, %26 : vector<1x128xf32>
    %c0_18 = arith.constant 0 : index
    %c0_19 = arith.constant 0 : index
    %28 = vector.load %arg8[%c0_18, %c0_19] : memref<1x128xf32, #tpu.memory_space<vmem>>, vector<1x128xf32>
    tpu.vector_store %arg8[%c0_18, %c0_19], %27 {strides = array<i32>} : memref<1x128xf32, #tpu.memory_space<vmem>>, vector<1x128xf32>,
    return
  }
  func.func @transform_0(%arg0: i32) -> (i32, i32) {
    %c0_i32 = arith.constant 0 : i32
    %c0_i32_0 = arith.constant 0 : i32
    return %arg0, %c0_i32 : i32, i32
  }
  func.func @transform_1(%arg0: i32) -> (i32, i32) {
    %c0_i32 = arith.constant 0 : i32
    %c0_i32_0 = arith.constant 0 : i32
    %c0_i32_1 = arith.constant 0 : i32
    return %c0_i32, %c0_i32_0 : i32, i32
  }
  func.func @transform_2(%arg0: i32) -> (i32, i32) {
    %c0_i32 = arith.constant 0 : i32
    %c0_i32_0 = arith.constant 0 : i32
    %c0_i32_1 = arith.constant 0 : i32
    return %c0_i32, %c0_i32_0 : i32, i32
  }
  func.func @transform_3(%arg0: i32) -> (i32, i32) {
    %c0_i32 = arith.constant 0 : i32
    %c0_i32_0 = arith.constant 0 : i32
    %c0_i32_1 = arith.constant 0 : i32
    return %c0_i32, %c0_i32_0 : i32, i32
  }
  func.func @transform_4(%arg0: i32) -> (i32, i32) {
    %c0_i32 = arith.constant 0 : i32
    %c0_i32_0 = arith.constant 0 : i32
    %c0_i32_1 = arith.constant 0 : i32
    return %c0_i32, %c0_i32_0 : i32, i32
  }
  func.func @transform_5(%arg0: i32) -> (i32, i32) {
    %c0_i32 = arith.constant 0 : i32
    %c0_i32_0 = arith.constant 0 : i32
    %c0_i32_1 = arith.constant 0 : i32
    return %c0_i32, %c0_i32_0 : i32, i32
  }
  func.func @transform_6(%arg0: i32) -> (i32, i32) {
    %c0_i32 = arith.constant 0 : i32
    %c0_i32_0 = arith.constant 0 : i32
    %c0_i32_1 = arith.constant 0 : i32
    return %c0_i32, %c0_i32_0 : i32, i32
  }
  func.func @transform_7(%arg0: i32) -> (i32, i32) {
    %c0_i32 = arith.constant 0 : i32
    %c0_i32_0 = arith.constant 0 : i32
    return %c0_i32, %arg0 : i32, i32
  }
}

</mosaic_0001>

<bundles_post_ra>
// kernel: baseline_cnn_forward.1
= control target key start
LH: loop header
LB: loop body
LE: loop exit
PB: predicated region body
PF: predicated region fallthrough
CT: control target
= control target key end

     0   :  { %vm156_vm0 = vcmask 465920   ;;  %v1138_v3 = vmov 0   ;;  %s1527_s0 = inlined_call_operand.vmem [shape: f32[8,57], index: 0, kind: input, shape index: {}]   ;;  %s1528_s6 = inlined_call_operand.<no memory space> [shape: f32[1,1], index: 6, kind: input, shape index: {}]   ;;  %s1529_s2 = inlined_call_operand.vmem [shape: f32[128,1], index: 2, kind: input, shape index: {}]   ;;  %s1530_s1 = inlined_call_operand.vmem [shape: f32[128,57], index: 1, kind: input, shape index: {}]   ;;  %s1531_s4 = inlined_call_operand.vmem [shape: f32[128,1], index: 4, kind: input, shape index: {}]   ;;  %s1532_s5 = inlined_call_operand.vmem [shape: f32[128,1], index: 5, kind: input, shape index: {}]   ;;  %s1533_s3 = inlined_call_operand.vmem [shape: f32[128,128], index: 3, kind: input, shape index: {}]   ;;  %s1534_s7 = inlined_call_operand.vmem [shape: f32[1,128], index: 7, kind: output, shape index: {}]  }
   0x1   :  { %v28_v0 = vld [vmem:[%s1527_s0] sm:$0xff]  ;;  %v29_v1 = vld [vmem:[%s1527_s0 + $0x8] sm:$0xff]  ;;  %vm1187_vm1 = vmpackc.low %vm156_vm0, %vm156_vm0  ;;  %1132 = vset.pattern.permute.xlu0 %v1138_v3  ;;  %1133 = vset.pattern.permute.xlu1 %v1138_v3  ;;  %v12_v4 = vstv %s1528_s6 }
   0x2   :  { %v1051_v5 = vpack.c.bf16 %v29_v1, %v28_v0  ;;  %v30_v6 = vld [vmem:[%s1527_s0 + $0x10] sm:$0xff]  ;;  %v31_v7 = vld [vmem:[%s1527_s0 + $0x18] sm:$0xff]  ;;  %13 = vst [vmem:[#allocation2] sm:$0x1] %v12_v4  ;;  %v60_v9 = vld [vmem:[%s1529_s2] sm:$0xff] }
   0x3   :  { %v1057_v8 = vpack.c.bf16 %v31_v7, %v30_v6  ;;  %v32_v10 = vld [vmem:[%s1527_s0 + $0x20] sm:$0xff]  ;;  %v33_v11 = vld [vmem:[%s1527_s0 + $0x28] sm:$0xff]  ;;  %78 = vperm.xlu0 %1132, %v60_v9   ;;  %v62_v12 = vld [vmem:[%s1529_s2 + $0x10] sm:$0xff] }
   0x4   :  { %1053 = vmatprep.subr.msk.bf16.mxu0 %vm1187_vm1, %v1051_v5  ;;  %v61_v13 = vld [vmem:[%s1529_s2 + $0x8] sm:$0xff]  ;;  %88 = vperm.xlu1 %1133, %v62_v12   ;;  %v44_v14 = vld [vmem:[%s1530_s1] sm:$0xff]  ;;  %v63_v15 = vld [vmem:[%s1529_s2 + $0x18] sm:$0xff]  ;;  %v1063_v16 = vpack.c.bf16 %v33_v11, %v32_v10 }
   0x5   :  { %1056 = vmatpush3.bf16.xpose.msk.msra.mxu0 %vm1187_vm1, %v1051_v5  ;;  %971 = vmatprep.mubr.msk.f32.mxu0 %vm156_vm0, %v44_v14  ;;  %v64_v17 = vld [vmem:[%s1529_s2 + $0x20] sm:$0xff]  ;;  %v65_v18 = vld [vmem:[%s1529_s2 + $0x28] sm:$0xff]  ;;  %v34_v19 = vld [vmem:[%s1527_s0 + $0x30] sm:$0xff] }
   0x6   :  { %1059 = vmatprep.subr.msk.bf16.mxu0 %vm1187_vm1, %v1057_v8  ;;  %v35_v20 = vld [vmem:[%s1527_s0 + $0x38] sm:$0xff]  ;;  %v66_v21 = vld [vmem:[%s1529_s2 + $0x30] sm:$0xff]  ;;  %v68_v24 = vld [vmem:[%s1529_s2 + $0x40] sm:$0xff] }
   0x7   :  { %83 = vperm.xlu0 %1132, %v61_v13   ;;  %v67_v22 = vld [vmem:[%s1529_s2 + $0x38] sm:$0xff]  ;;  %v1069_v23 = vpack.c.bf16 %v35_v20, %v34_v19  ;;  %v69_v25 = vld [vmem:[%s1529_s2 + $0x48] sm:$0xff]  ;;  %v36_v26 = vld [vmem:[%s1527_s0 + $0x40] sm:$0xff] }
   0x8   :  { %93 = vperm.xlu1 %1133, %v63_v15   ;;  %v37_v27 = vld [vmem:[%s1527_s0 + $0x48] sm:$0xff]  ;;  %v70_v28 = vld [vmem:[%s1529_s2 + $0x50] sm:$0xff]  ;;  %v71_v29 = vld [vmem:[%s1529_s2 + $0x58] sm:$0xff] }
   0x9   :  { %v1075_v30 = vpack.c.bf16 %v37_v27, %v36_v26  ;;  %v72_v31 = vld [vmem:[%s1529_s2 + $0x60] sm:$0xff]  ;;  %v73_v32 = vld [vmem:[%s1529_s2 + $0x68] sm:$0xff]  ;;  %v38_v33 = vld [vmem:[%s1527_s0 + $0x50] sm:$0xff] }
   0xa   :  { %v39_v34 = vld [vmem:[%s1527_s0 + $0x58] sm:$0xff]  ;;  %v74_v35 = vld [vmem:[%s1529_s2 + $0x70] sm:$0xff]  ;;  %v430_v38 = vld [vmem:[%s1531_s4] sm:$0xff] }
   0xb   :  { %98 = vperm.xlu0 %1132, %v64_v17   ;;  %v75_v36 = vld [vmem:[%s1529_s2 + $0x78] sm:$0xff]  ;;  %v1081_v37 = vpack.c.bf16 %v39_v34, %v38_v33  ;;  %v431_v39 = vld [vmem:[%s1531_s4 + $0x8] sm:$0xff]  ;;  %v40_v40 = vld [vmem:[%s1527_s0 + $0x60] sm:$0xff] }
   0xc   :  { %103 = vperm.xlu1 %1133, %v65_v18   ;;  %v41_v41 = vld [vmem:[%s1527_s0 + $0x68] sm:$0xff]  ;;  %v432_v42 = vld [vmem:[%s1531_s4 + $0x10] sm:$0xff]  ;;  %v433_v43 = vld [vmem:[%s1531_s4 + $0x18] sm:$0xff] }
   0xd   :  { %1062 = vmatpush3.bf16.xpose.msk.msra.mxu0 %vm1187_vm1, %v1057_v8  ;;  %v1087_v44 = vpack.c.bf16 %v41_v41, %v40_v40  ;;  %v687_v45 = vld [vmem:[%s1532_s5] sm:$0xff]  ;;  %v688_v46 = vld [vmem:[%s1532_s5 + $0x8] sm:$0xff]  ;;  %v42_v47 = vld [vmem:[%s1527_s0 + $0x70] sm:$0xff] }
   0xe   :  { %1065 = vmatprep.subr.msk.bf16.mxu0 %vm1187_vm1, %v1063_v16  ;;  %v43_v48 = vld [vmem:[%s1527_s0 + $0x78] sm:$0xff]  ;;  %v434_v49 = vld [vmem:[%s1531_s4 + $0x20] sm:$0xff]  ;;  %v689_v50 = vld [vmem:[%s1532_s5 + $0x10] sm:$0xff] }
   0xf   :  { %108 = vperm.xlu0 %1132, %v66_v21   ;;  %v1093_v51 = vpack.c.bf16 %v43_v48, %v42_v47  ;;  %v435_v52 = vld [vmem:[%s1531_s4 + $0x28] sm:$0xff]  ;;  %v690_v53 = vld [vmem:[%s1532_s5 + $0x18] sm:$0xff]  ;;  %v436_v54 = vld [vmem:[%s1531_s4 + $0x30] sm:$0xff] }
  0x10   :  { %113 = vperm.xlu1 %1133, %v67_v22   ;;  %v691_v55 = vld [vmem:[%s1532_s5 + $0x20] sm:$0xff]  ;;  %v437_v56 = vld [vmem:[%s1531_s4 + $0x38] sm:$0xff]  ;;  %v692_v57 = vld [vmem:[%s1532_s5 + $0x28] sm:$0xff] }
  0x11   :  { %v438_v58 = vld [vmem:[%s1531_s4 + $0x40] sm:$0xff]  ;;  %v45_v59 = vld [vmem:[%s1530_s1 + $0x8] sm:$0xff]  ;;  %v693_v60 = vld [vmem:[%s1532_s5 + $0x30] sm:$0xff] }
  0x12   :  { %v46_v61 = vld [vmem:[%s1530_s1 + $0x10] sm:$0xff]  ;;  %v439_v62 = vld [vmem:[%s1531_s4 + $0x48] sm:$0xff]  ;;  %v47_v63 = vld [vmem:[%s1530_s1 + $0x18] sm:$0xff] }
  0x13   :  { %118 = vperm.xlu0 %1132, %v68_v24   ;;  %v694_v0 = vld [vmem:[%s1532_s5 + $0x38] sm:$0xff]  ;;  %v48_v1 = vld [vmem:[%s1530_s1 + $0x20] sm:$0xff]  ;;  %v440_v2 = vld [vmem:[%s1531_s4 + $0x50] sm:$0xff] }
  0x14   :  { %123 = vperm.xlu1 %1133, %v69_v25   ;;  %v49_v3 = vld [vmem:[%s1530_s1 + $0x28] sm:$0xff]  ;;  %v695_v4 = vld [vmem:[%s1532_s5 + $0x40] sm:$0xff]  ;;  %v50_v5 = vld [vmem:[%s1530_s1 + $0x30] sm:$0xff] }
  0x15   :  { %1068 = vmatpush3.bf16.xpose.msk.msra.mxu0 %vm1187_vm1, %v1063_v16  ;;  %v441_v6 = vld [vmem:[%s1531_s4 + $0x58] sm:$0xff]  ;;  %v696_v8 = vld [vmem:[%s1532_s5 + $0x48] sm:$0xff]  ;;  %v52_v9 = vld [vmem:[%s1530_s1 + $0x40] sm:$0xff] }
  0x16   :  { %1071 = vmatprep.subr.msk.bf16.mxu0 %vm1187_vm1, %v1069_v23  ;;  %v51_v7 = vld [vmem:[%s1530_s1 + $0x38] sm:$0xff]  ;;  %v442_v10 = vld [vmem:[%s1531_s4 + $0x60] sm:$0xff]  ;;  %v53_v11 = vld [vmem:[%s1530_s1 + $0x48] sm:$0xff] }
  0x17   :  { %128 = vperm.xlu0 %1132, %v70_v28   ;;  %v697_v12 = vld [vmem:[%s1532_s5 + $0x50] sm:$0xff]  ;;  %v443_v14 = vld [vmem:[%s1531_s4 + $0x68] sm:$0xff]  ;;  %v55_v15 = vld [vmem:[%s1530_s1 + $0x58] sm:$0xff] }
  0x18   :  { %133 = vperm.xlu1 %1133, %v71_v29   ;;  %v54_v13 = vld [vmem:[%s1530_s1 + $0x50] sm:$0xff]  ;;  %v698_v16 = vld [vmem:[%s1532_s5 + $0x58] sm:$0xff]  ;;  %v56_v17 = vld [vmem:[%s1530_s1 + $0x60] sm:$0xff] }
  0x19   :  { %v444_v18 = vld [vmem:[%s1531_s4 + $0x70] sm:$0xff]  ;;  %v57_v19 = vld [vmem:[%s1530_s1 + $0x68] sm:$0xff]  ;;  %v699_v20 = vld [vmem:[%s1532_s5 + $0x60] sm:$0xff] }
  0x1a   :  { %v58_v21 = vld [vmem:[%s1530_s1 + $0x70] sm:$0xff]  ;;  %v445_v22 = vld [vmem:[%s1531_s4 + $0x78] sm:$0xff]  ;;  %v700_v24 = vld [vmem:[%s1532_s5 + $0x68] sm:$0xff] }
  0x1b   :  { %138 = vperm.xlu0 %1132, %v72_v31   ;;  %v701_v25 = vld [vmem:[%s1532_s5 + $0x70] sm:$0xff]  ;;  %v702_v26 = vld [vmem:[%s1532_s5 + $0x78] sm:$0xff]  ;;  %v820_v27 = vld [vmem:[#allocation2] sm:$0x1] }
  0x1c   :  { %143 = vperm.xlu1 %1133, %v73_v32   ;;  %v414_v28 = vld [vmem:[%s1533_s3] sm:$0xff] }
  0x1d   :  { %1074 = vmatpush3.bf16.xpose.msk.msra.mxu0 %vm1187_vm1, %v1069_v23  ;;  %v59_v23 = vld [vmem:[%s1530_s1 + $0x78] sm:$0xff]  ;;  %1027 = vmatprep.mubr.f32.mxu1 %v414_v28 }
  0x1e   :  { %1077 = vmatprep.subr.msk.bf16.mxu0 %vm1187_vm1, %v1075_v30 }
  0x1f   :  { %148 = vperm.xlu0 %1132, %v74_v35  }
  0x20   :  { %153 = vperm.xlu1 %1133, %v75_v36  }
  0x23   :  { %448 = vperm.xlu0 %1132, %v430_v38  }
  0x24   :  { %453 = vperm.xlu1 %1133, %v431_v39  }
  0x25   :  { %1080 = vmatpush3.bf16.xpose.msk.msra.mxu0 %vm1187_vm1, %v1075_v30 }
  0x26   :  { %1083 = vmatprep.subr.msk.bf16.mxu0 %vm1187_vm1, %v1081_v37 }
  0x27   :  { %458 = vperm.xlu0 %1132, %v432_v42  }
  0x28   :  { %463 = vperm.xlu1 %1133, %v433_v43  }
  0x2b   :  { %705 = vperm.xlu0 %1132, %v687_v45  }
  0x2c   :  { %710 = vperm.xlu1 %1133, %v688_v46  }
  0x2d   :  { %1086 = vmatpush3.bf16.xpose.msk.msra.mxu0 %vm1187_vm1, %v1081_v37 }
  0x2e   :  { %1089 = vmatprep.subr.msk.bf16.mxu0 %vm1187_vm1, %v1087_v44 }
  0x2f   :  { %468 = vperm.xlu0 %1132, %v434_v49  }
  0x30   :  { %715 = vperm.xlu1 %1133, %v689_v50  }
  0x33   :  { %473 = vperm.xlu0 %1132, %v435_v52  }
  0x34   :  { %720 = vperm.xlu1 %1133, %v690_v53  }
  0x35   :  { %1092 = vmatpush3.bf16.xpose.msk.msra.mxu0 %vm1187_vm1, %v1087_v44 }
  0x36   :  { %1095 = vmatprep.subr.msk.bf16.mxu0 %vm1187_vm1, %v1093_v51 }
  0x37   :  { %478 = vperm.xlu0 %1132, %v436_v54  }
  0x38   :  { %725 = vperm.xlu1 %1133, %v691_v55  }
  0x3b   :  { %483 = vperm.xlu0 %1132, %v437_v56  }
  0x3c   :  { %730 = vperm.xlu1 %1133, %v692_v57  }
  0x3d   :  { %1098 = vmatpush3.bf16.xpose.msk.msra.mxu0 %vm1187_vm1, %v1093_v51 }
  0x3f   :  { %488 = vperm.xlu0 %1132, %v438_v58  }
  0x40   :  { %735 = vperm.xlu1 %1133, %v693_v60  }
  0x43   :  { %493 = vperm.xlu0 %1132, %v439_v62  }
  0x44   :  { %972 = vmatmul.mubr.msk.f32.vlgmr.msra.gmra.mrb[0].mxu0 %vm156_vm0, %v45_v59  ;;  %740 = vperm.xlu1 %1133, %v694_v0  }
  0x45   :  { %974 = vmatprep.mubr.msk.f32.mxu0 %vm156_vm0, %v46_v61 }
  0x47   :  { %498 = vperm.xlu0 %1132, %v440_v2  }
  0x48   :  { %975 = vmatmul.mubr.msk.f32.gmra.mrb[2].mxu0 %vm156_vm0, %v47_v63  ;;  %745 = vperm.xlu1 %1133, %v695_v4  }
  0x49   :  { %977 = vmatprep.mubr.msk.f32.mxu0 %vm156_vm0, %v48_v1 }
  0x4b   :  { %503 = vperm.xlu0 %1132, %v441_v6  }
  0x4c   :  { %978 = vmatmul.mubr.msk.f32.gmra.mrb[4].mxu0 %vm156_vm0, %v49_v3  ;;  %750 = vperm.xlu1 %1133, %v696_v8  }
  0x4d   :  { %980 = vmatprep.mubr.msk.f32.mxu0 %vm156_vm0, %v50_v5 }
  0x4f   :  { %508 = vperm.xlu0 %1132, %v442_v10  }
  0x50   :  { %981 = vmatmul.mubr.msk.f32.gmra.mrb[6].mxu0 %vm156_vm0, %v51_v7  ;;  %755 = vperm.xlu1 %1133, %v697_v12  }
  0x51   :  { %983 = vmatprep.mubr.msk.f32.mxu0 %vm156_vm0, %v52_v9 }
  0x53   :  { %513 = vperm.xlu0 %1132, %v443_v14  }
  0x54   :  { %984 = vmatmul.mubr.msk.f32.gmra.mrb[8].mxu0 %vm156_vm0, %v53_v11  ;;  %760 = vperm.xlu1 %1133, %v698_v16  }
  0x55   :  { %986 = vmatprep.mubr.msk.f32.mxu0 %vm156_vm0, %v54_v13 }
  0x57   :  { %518 = vperm.xlu0 %1132, %v444_v18  }
  0x58   :  { %987 = vmatmul.mubr.msk.f32.gmra.mrb[10].mxu0 %vm156_vm0, %v55_v15  ;;  %765 = vperm.xlu1 %1133, %v699_v20  }
  0x59   :  { %989 = vmatprep.mubr.msk.f32.mxu0 %vm156_vm0, %v56_v17 }
  0x5b   :  { %523 = vperm.xlu0 %1132, %v445_v22  }
  0x5c   :  { %990 = vmatmul.mubr.msk.f32.gmra.mrb[12].mxu0 %vm156_vm0, %v57_v19  ;;  %770 = vperm.xlu1 %1133, %v700_v24  }
  0x5d   :  { %992 = vmatprep.mubr.msk.f32.mxu0 %vm156_vm0, %v58_v21 }
  0x5f   :  { %775 = vperm.xlu0 %1132, %v701_v25  }
  0x60   :  { %993 = vmatmul.mubr.msk.f32.gmra.mrb[14].mxu0 %vm156_vm0, %v59_v23  ;;  %780 = vperm.xlu1 %1133, %v702_v26  }
  0x63   :  { %823 = vperm.xlu0 %1132, %v820_v27  }
  0x82   :  { %v79_v30 = vpop.permute.xlu0 %78 }
  0x83   :  { %v89_v29 = vpop.permute.xlu1 %88 }
  0x86   :  { %v84_v32 = vpop.permute.xlu0 %83 }
  0x87   :  { %v94_v31 = vpop.permute.xlu1 %93 }
  0x8a   :  { %v99_v34 = vpop.permute.xlu0 %98 }
  0x8b   :  { %v104_v33 = vpop.permute.xlu1 %103 }
  0x8e   :  { %v109_v43 = vpop.permute.xlu0 %108 }
  0x8f   :  { %v114_v40 = vpop.permute.xlu1 %113 }
  0x92   :  { %v119_v56 = vpop.permute.xlu0 %118 }
  0x93   :  { %v124_v53 = vpop.permute.xlu1 %123 }
  0x96   :  { %v129_v4 = vpop.permute.xlu0 %128 }
  0x97   :  { %v134_v1 = vpop.permute.xlu1 %133 }
  0x9a   :  { %v139_v17 = vpop.permute.xlu0 %138 }
  0x9b   :  { %v144_v14 = vpop.permute.xlu1 %143 }
  0x9f   :  { %v154_v26 = vpop.permute.xlu1 %153 }
 0x117   :  { %v973_v35 = vpop.f32.mrb[0].mxu0 }
 0x118   :  { %v325_v36 = vadd.f32 %v973_v35, %v84_v32  ;;  %v319_v37 = vpop.f32.mrb[1].mxu0 }
 0x119   :  { %v320_v38 = vadd.f32 %v319_v37, %v79_v30  ;;  %v415_v37 = vld [vmem:[%s1533_s3 + $0x8] sm:$0xff] }
 0x11a   :  { %v399_v39 = vmax.f32 %v325_v36, 0.0 }
 0x11b   :  { %v398_v41 = vmax.f32 %v320_v38, 0.0  ;;  %v976_v42 = vpop.f32.mrb[2].mxu0  ;;  %v416_v38 = vld [vmem:[%s1533_s3 + $0x10] sm:$0xff] }
 0x11c   :  { %v335_v44 = vadd.f32 %v976_v42, %v94_v31  ;;  %v329_v45 = vpop.f32.mrb[3].mxu0  ;;  %v420_v42 = vld [vmem:[%s1533_s3 + $0x30] sm:$0xff] }
 0x11d   :  { %v330_v46 = vadd.f32 %v329_v45, %v89_v29  ;;  %v1099_v47 = vpack.c.bf16 %v399_v39, %v398_v41  ;;  %v149_v29 = vpop.permute.xlu0 %148  ;;  %v417_v39 = vld [vmem:[%s1533_s3 + $0x18] sm:$0xff]  ;;  %v419_v41 = vld [vmem:[%s1533_s3 + $0x28] sm:$0xff] }
 0x11e   :  { %v401_v48 = vmax.f32 %v335_v44, 0.0  ;;  %v422_v44 = vld [vmem:[%s1533_s3 + $0x40] sm:$0xff]  ;;  %v423_v45 = vld [vmem:[%s1533_s3 + $0x48] sm:$0xff] }
 0x11f   :  { %v400_v49 = vmax.f32 %v330_v46, 0.0  ;;  %v979_v50 = vpop.f32.mrb[4].mxu0  ;;  %1100 = vmatprep.subr.bf16.mxu1 %v1099_v47  ;;  %v424_v46 = vld [vmem:[%s1533_s3 + $0x50] sm:$0xff] }
 0x120   :  { %v345_v51 = vadd.f32 %v979_v50, %v104_v33  ;;  %v339_v52 = vpop.f32.mrb[5].mxu0  ;;  %1102 = vmatpush3.bf16.msra.mxu1 %v1099_v47  ;;  %v425_v47 = vld [vmem:[%s1533_s3 + $0x58] sm:$0xff]  ;;  %v428_v50 = vld [vmem:[%s1533_s3 + $0x70] sm:$0xff] }
 0x121   :  { %v1103_v54 = vpack.c.bf16 %v401_v48, %v400_v49  ;;  %v340_v55 = vadd.f32 %v339_v52, %v99_v34  ;;  %v426_v48 = vld [vmem:[%s1533_s3 + $0x60] sm:$0xff]  ;;  %v427_v49 = vld [vmem:[%s1533_s3 + $0x68] sm:$0xff]  ;;  %v449_v52 = vpop.permute.xlu0 %448 }
 0x122   :  { %v403_v57 = vmax.f32 %v345_v51, 0.0  ;;  %v429_v51 = vld [vmem:[%s1533_s3 + $0x78] sm:$0xff] }
 0x123   :  { %v402_v58 = vmax.f32 %v340_v55, 0.0  ;;  %v982_v59 = vpop.f32.mrb[6].mxu0  ;;  %1104 = vmatprep.subr.bf16.mxu1 %v1103_v54 }
 0x124   :  { %v355_v60 = vadd.f32 %v982_v59, %v114_v40  ;;  %v349_v61 = vpop.f32.mrb[7].mxu0  ;;  %1106 = vmatpush3.bf16.msra.mxu1 %v1103_v54  ;;  %v418_v40 = vld [vmem:[%s1533_s3 + $0x20] sm:$0xff] }
 0x125   :  { %v1107_v62 = vpack.c.bf16 %v403_v57, %v402_v58  ;;  %v350_v63 = vadd.f32 %v349_v61, %v109_v43  ;;  %v421_v43 = vld [vmem:[%s1533_s3 + $0x38] sm:$0xff]  ;;  %v459_v54 = vpop.permute.xlu0 %458 }
 0x126   :  { %v405_v0 = vmax.f32 %v355_v60, 0.0 }
 0x127   :  { %v404_v2 = vmax.f32 %v350_v63, 0.0  ;;  %v985_v3 = vpop.f32.mrb[8].mxu0  ;;  %1108 = vmatprep.subr.bf16.mxu1 %v1107_v62 }
 0x128   :  { %v365_v5 = vadd.f32 %v985_v3, %v124_v53  ;;  %v359_v6 = vpop.f32.mrb[9].mxu0  ;;  %1110 = vmatpush3.bf16.msra.mxu1 %v1107_v62  ;;  %v454_v53 = vpop.permute.xlu1 %453 }
 0x129   :  { %v1111_v7 = vpack.c.bf16 %v405_v0, %v404_v2  ;;  %v360_v8 = vadd.f32 %v359_v6, %v119_v56  ;;  %v706_v56 = vpop.permute.xlu0 %705 }
 0x12a   :  { %v407_v9 = vmax.f32 %v365_v5, 0.0 }
 0x12b   :  { %v406_v10 = vmax.f32 %v360_v8, 0.0  ;;  %v988_v11 = vpop.f32.mrb[10].mxu0  ;;  %1112 = vmatprep.subr.bf16.mxu1 %v1111_v7 }
 0x12c   :  { %v375_v12 = vadd.f32 %v988_v11, %v134_v1  ;;  %v369_v13 = vpop.f32.mrb[11].mxu0  ;;  %1114 = vmatpush3.bf16.msra.mxu1 %v1111_v7  ;;  %v464_v55 = vpop.permute.xlu1 %463 }
 0x12d   :  { %v1115_v15 = vpack.c.bf16 %v407_v9, %v406_v10  ;;  %v370_v16 = vadd.f32 %v369_v13, %v129_v4  ;;  %v469_v58 = vpop.permute.xlu0 %468 }
 0x12e   :  { %v409_v18 = vmax.f32 %v375_v12, 0.0 }
 0x12f   :  { %v408_v19 = vmax.f32 %v370_v16, 0.0  ;;  %v991_v20 = vpop.f32.mrb[12].mxu0  ;;  %1116 = vmatprep.subr.bf16.mxu1 %v1115_v15 }
 0x130   :  { %v385_v21 = vadd.f32 %v991_v20, %v144_v14  ;;  %v379_v22 = vpop.f32.mrb[13].mxu0  ;;  %1118 = vmatpush3.bf16.msra.mxu1 %v1115_v15  ;;  %v711_v57 = vpop.permute.xlu1 %710 }
 0x131   :  { %v1119_v23 = vpack.c.bf16 %v409_v18, %v408_v19  ;;  %v380_v24 = vadd.f32 %v379_v22, %v139_v17  ;;  %v474_v60 = vpop.permute.xlu0 %473 }
 0x132   :  { %v411_v25 = vmax.f32 %v385_v21, 0.0 }
 0x133   :  { %v410_v27 = vmax.f32 %v380_v24, 0.0  ;;  %v994_v28 = vpop.f32.mrb[14].mxu0  ;;  %1120 = vmatprep.subr.bf16.mxu1 %v1119_v23 }
 0x134   :  { %v395_v30 = vadd.f32 %v994_v28, %v154_v26  ;;  %v389_v31 = vpop.f32.mrb[15].mxu0  ;;  %1122 = vmatpush3.bf16.msra.mxu1 %v1119_v23  ;;  %v716_v59 = vpop.permute.xlu1 %715 }
 0x135   :  { %v1123_v32 = vpack.c.bf16 %v411_v25, %v410_v27  ;;  %v390_v33 = vadd.f32 %v389_v31, %v149_v29  ;;  %v479_v62 = vpop.permute.xlu0 %478 }
 0x136   :  { %v413_v34 = vmax.f32 %v395_v30, 0.0 }
 0x137   :  { %v412_v35 = vmax.f32 %v390_v33, 0.0  ;;  %1124 = vmatprep.subr.bf16.mxu1 %v1123_v32 }
 0x138   :  { %1126 = vmatpush3.bf16.msra.mxu1 %v1123_v32  ;;  %v721_v61 = vpop.permute.xlu1 %720 }
 0x139   :  { %v1127_v36 = vpack.c.bf16 %v413_v34, %v412_v35  ;;  %v484_v0 = vpop.permute.xlu0 %483 }
 0x13b   :  { %1128 = vmatprep.subr.bf16.mxu1 %v1127_v36 }
 0x13c   :  { %1130 = vmatpush3.bf16.msra.mxu1 %v1127_v36  ;;  %v726_v63 = vpop.permute.xlu1 %725 }
 0x13d   :  { %v489_v2 = vpop.permute.xlu0 %488 }
 0x13f   :  { %1028 = vmatmul.mubr.f32.vlgmr.msra.gmra.mrb[0].mxu1 %v415_v37 }
 0x140   :  { %1030 = vmatprep.mubr.f32.mxu1 %v416_v38  ;;  %v731_v1 = vpop.permute.xlu1 %730 }
 0x141   :  { %v494_v4 = vpop.permute.xlu0 %493 }
 0x143   :  { %1031 = vmatmul.mubr.f32.gmra.mrb[2].mxu1 %v417_v39 }
 0x144   :  { %1033 = vmatprep.mubr.f32.mxu1 %v418_v40  ;;  %v736_v3 = vpop.permute.xlu1 %735 }
 0x145   :  { %v499_v6 = vpop.permute.xlu0 %498 }
 0x147   :  { %1034 = vmatmul.mubr.f32.gmra.mrb[4].mxu1 %v419_v41 }
 0x148   :  { %1036 = vmatprep.mubr.f32.mxu1 %v420_v42  ;;  %v741_v5 = vpop.permute.xlu1 %740 }
 0x149   :  { %v504_v12 = vpop.permute.xlu0 %503 }
 0x14b   :  { %1037 = vmatmul.mubr.f32.gmra.mrb[6].mxu1 %v421_v43 }
 0x14c   :  { %1039 = vmatprep.mubr.f32.mxu1 %v422_v44  ;;  %v746_v7 = vpop.permute.xlu1 %745 }
 0x14d   :  { %v509_v26 = vpop.permute.xlu0 %508 }
 0x14f   :  { %1040 = vmatmul.mubr.f32.gmra.mrb[8].mxu1 %v423_v45 }
 0x150   :  { %1042 = vmatprep.mubr.f32.mxu1 %v424_v46  ;;  %v751_v16 = vpop.permute.xlu1 %750 }
 0x151   :  { %v514_v42 = vpop.permute.xlu0 %513 }
 0x153   :  { %1043 = vmatmul.mubr.f32.gmra.mrb[10].mxu1 %v425_v47 }
 0x154   :  { %1045 = vmatprep.mubr.f32.mxu1 %v426_v48  ;;  %v756_v31 = vpop.permute.xlu1 %755 }
 0x157   :  { %1046 = vmatmul.mubr.f32.gmra.mrb[12].mxu1 %v427_v49 }
 0x158   :  { %1048 = vmatprep.mubr.f32.mxu1 %v428_v50  ;;  %v761_v48 = vpop.permute.xlu1 %760 }
 0x15b   :  { %1049 = vmatmul.mubr.f32.gmra.mrb[14].mxu1 %v429_v51 }
 0x212   :  { %v1029_v8 = vpop.f32.mrb[0].mxu1 }
 0x213   :  { %v598_v9 = vadd.f32 %v1029_v8, %v454_v53  ;;  %v592_v10 = vpop.f32.mrb[1].mxu1 }
 0x214   :  { %v593_v11 = vadd.f32 %v592_v10, %v449_v52 }
 0x215   :  { %v672_v13 = vmax.f32 %v598_v9, 0.0 }
 0x216   :  { %v671_v14 = vmax.f32 %v593_v11, 0.0  ;;  %v1032_v15 = vpop.f32.mrb[2].mxu1 }
 0x217   :  { %v784_v17 = vmul.f32 %v711_v57, %v672_v13  ;;  %v608_v18 = vadd.f32 %v1032_v15, %v464_v55  ;;  %v602_v19 = vpop.f32.mrb[3].mxu1 }
 0x218   :  { %v783_v20 = vmul.f32 %v706_v56, %v671_v14  ;;  %v603_v21 = vadd.f32 %v602_v19, %v459_v54 }
 0x219   :  { %v674_v23 = vmax.f32 %v608_v18, 0.0 }
 0x21a   :  { %v799_v22 = vadd.f32 %v784_v17, %v783_v20  ;;  %v673_v24 = vmax.f32 %v603_v21, 0.0  ;;  %v1035_v25 = vpop.f32.mrb[4].mxu1 }
 0x21b   :  { %v618_v27 = vadd.f32 %v1035_v25, %v474_v60  ;;  %v612_v28 = vpop.f32.mrb[5].mxu1  ;;  %v786_v32 = vmul.f32 %v721_v61, %v674_v23 }
 0x21c   :  { %v785_v29 = vmul.f32 %v716_v59, %v673_v24  ;;  %v613_v30 = vadd.f32 %v612_v28, %v469_v58  ;;  %v519_v59 = vpop.permute.xlu0 %518 }
 0x21d   :  { %v676_v34 = vmax.f32 %v618_v27, 0.0 }
 0x21e   :  { %v800_v33 = vadd.f32 %v799_v22, %v785_v29  ;;  %v675_v35 = vmax.f32 %v613_v30, 0.0  ;;  %v1038_v36 = vpop.f32.mrb[6].mxu1 }
 0x21f   :  { %v628_v37 = vadd.f32 %v1038_v36, %v484_v0  ;;  %v622_v38 = vpop.f32.mrb[7].mxu1  ;;  %v788_v43 = vmul.f32 %v731_v1, %v676_v34  ;;  %v766_v1 = vpop.permute.xlu1 %765  ;;  %v826_v34 = vlaneseq }
 0x220   :  { %v787_v39 = vmul.f32 %v726_v63, %v675_v35  ;;  %v801_v40 = vadd.f32 %v800_v33, %v786_v32  ;;  %v623_v41 = vadd.f32 %v622_v38, %v479_v62  ;;  %v524_v15 = vpop.permute.xlu0 %523 }
 0x221   :  { %v678_v45 = vmax.f32 %v628_v37, 0.0  ;;  %v827_v37 = vshrl.u32 %v826_v34, 7 }
 0x222   :  { %v802_v44 = vadd.f32 %v801_v40, %v787_v39  ;;  %v677_v46 = vmax.f32 %v623_v41, 0.0  ;;  %v1041_v47 = vpop.f32.mrb[8].mxu1 }
 0x223   :  { %v638_v49 = vadd.f32 %v1041_v47, %v494_v4  ;;  %v632_v50 = vpop.f32.mrb[9].mxu1  ;;  %v790_v54 = vmul.f32 %v741_v5, %v678_v45  ;;  %v828_v40 = vsub.s32 0, %v827_v37 }
 0x224   :  { %v789_v51 = vmul.f32 %v736_v3, %v677_v46  ;;  %v803_v52 = vadd.f32 %v802_v44, %v788_v43  ;;  %v633_v53 = vadd.f32 %v632_v50, %v489_v2  ;;  %v776_v29 = vpop.permute.xlu0 %775 }
 0x225   :  { %v680_v56 = vmax.f32 %v638_v49, 0.0 }
 0x226   :  { %v804_v55 = vadd.f32 %v803_v52, %v789_v51  ;;  %v679_v57 = vmax.f32 %v633_v53, 0.0  ;;  %v1044_v58 = vpop.f32.mrb[10].mxu1 }
 0x227   :  { %v648_v60 = vadd.f32 %v1044_v58, %v504_v12  ;;  %v642_v61 = vpop.f32.mrb[11].mxu1  ;;  %v792_v8 = vmul.f32 %v751_v16, %v680_v56 }
 0x228   :  { %v791_v62 = vmul.f32 %v746_v7, %v679_v57  ;;  %v805_v63 = vadd.f32 %v804_v55, %v790_v54  ;;  %v643_v0 = vadd.f32 %v642_v61, %v499_v6  ;;  %v771_v7 = vpop.permute.xlu1 %770 }
 0x229   :  { %v682_v10 = vmax.f32 %v648_v60, 0.0 }
 0x22a   :  { %v806_v9 = vadd.f32 %v805_v63, %v791_v62  ;;  %v681_v4 = vmax.f32 %v643_v0, 0.0  ;;  %v1047_v11 = vpop.f32.mrb[12].mxu1 }
 0x22b   :  { %v658_v3 = vadd.f32 %v1047_v11, %v514_v42  ;;  %v652_v13 = vpop.f32.mrb[13].mxu1  ;;  %v794_v17 = vmul.f32 %v761_v48, %v682_v10  ;;  %v824_v42 = vpop.permute.xlu0 %823 }
 0x22c   :  { %v793_v2 = vmul.f32 %v756_v31, %v681_v4  ;;  %v807_v5 = vadd.f32 %v806_v9, %v792_v8  ;;  %v653_v14 = vadd.f32 %v652_v13, %v509_v26  ;;  %v781_v26 = vpop.permute.xlu1 %780  ;;  %v829_v44 = vrot.slane %v824_v42, %v828_v40 }
 0x22d   :  { %v684_v19 = vmax.f32 %v658_v3, 0.0 }
 0x22e   :  { %v808_v18 = vadd.f32 %v807_v5, %v793_v2  ;;  %v683_v12 = vmax.f32 %v653_v14, 0.0  ;;  %v1050_v20 = vpop.f32.mrb[14].mxu1 }
 0x22f   :  { %v668_v21 = vadd.f32 %v1050_v20, %v524_v15  ;;  %v662_v6 = vpop.f32.mrb[15].mxu1  ;;  %v796_v24 = vmul.f32 %v771_v7, %v684_v19 }
 0x230   :  { %v795_v22 = vmul.f32 %v766_v1, %v683_v12  ;;  %v809_v16 = vadd.f32 %v808_v18, %v794_v17  ;;  %v663_v23 = vadd.f32 %v662_v6, %v519_v59 }
 0x231   :  { %v686_v27 = vmax.f32 %v668_v21, 0.0 }
 0x232   :  { %v810_v25 = vadd.f32 %v809_v16, %v795_v22  ;;  %v685_v28 = vmax.f32 %v663_v23, 0.0 }
 0x233   :  { %v798_v32 = vmul.f32 %v781_v26, %v686_v27 }
 0x234   :  { %v797_v30 = vmul.f32 %v776_v29, %v685_v28  ;;  %v811_v31 = vadd.f32 %v810_v25, %v796_v24 }
 0x236   :  { %v812_v33 = vadd.f32 %v811_v31, %v797_v30 }
 0x238   :  { %v813_v35 = vadd.f32 %v812_v33, %v798_v32 }
 0x23a   :  { %v814_v36 = vrot.slane %v813_v35, 4 }
 0x23c   :  { %v815_v38 = vadd.f32 %v814_v36, %v813_v35 }
 0x23e   :  { %v816_v39 = vrot.slane %v815_v38, 2 }
 0x240   :  { %v817_v41 = vadd.f32 %v816_v39, %v815_v38 }
 0x242   :  { %v818_v43 = vrot.slane %v817_v41, 1 }
 0x244   :  { %v819_v45 = vadd.f32 %v818_v43, %v817_v41 }
 0x246   :  { %v830_v46 = vadd.f32 %v829_v44, %v819_v45 }
 0x248   :  { %v874_v47 = vmul.f32 -1.442695, %v830_v46 }
 0x24a   :  { %1134 = vpow2.f32 %v874_v47 }
 0x254   :  { %v1135_v48 = vpop.eup %1134 }
 0x255   :  { %v834_v49 = vadd.f32 1.0, %v1135_v48 }
 0x257   :  { %1136 = vrcp.f32 %v834_v49 }
 0x261   :  { %v1137_v50 = vpop.eup %1136 }
 0x262   :  { %837 = vst [vmem:[%s1534_s7] sm:$0x1] %v1137_v50 }

</bundles_post_ra>
